<compile_context>
chip_gen: v5e
topology: v5e:2x2
jax: 0.10.0
libtpu: 0.0.40
codegen_flags: <defaults>
</compile_context>

<pallas_src>
import jax
import jax.numpy as jnp
from jax.experimental import pallas as pl
from jax.experimental.pallas import tpu as pltpu

_LANE = 128
_SUBLANE = 8


def _round_up(x, m):
    return ((x + m - 1) // m) * m


def critic_kernel(a_ref, s_ref, wa_ref, ws_ref, b_in_ref, wo_ref, bo_ref,
                  out_ref):
    # Hidden layer: two tiny MXU passes (K=4 and K=8) + fused bias, then relu.
    h = (jnp.dot(a_ref[...], wa_ref[...], preferred_element_type=jnp.float32)
         + jnp.dot(s_ref[...], ws_ref[...], preferred_element_type=jnp.float32)
         + b_in_ref[...])
    h = jnp.maximum(h, 0.0)
    # Output layer written directly into the narrow (tb, n_outputs) block.
    out_ref[...] = (jnp.dot(h, wo_ref[...], preferred_element_type=jnp.float32)
                    + bo_ref[...]).astype(out_ref.dtype)


def pack_params(params):
    """One-time packing: fuse biases, pad hidden dim to 128 lanes (exact)."""
    wa, ba, ws, bs, wo, bo = params
    n_hidden = wa.shape[1]
    h_pad = _round_up(n_hidden, _LANE)
    pad_h = h_pad - n_hidden
    wa_p = jnp.pad(wa.astype(jnp.float32), ((0, 0), (0, pad_h)))
    ws_p = jnp.pad(ws.astype(jnp.float32), ((0, 0), (0, pad_h)))
    b_in = jnp.pad((ba + bs).astype(jnp.float32), ((0, 0), (0, pad_h)))
    wo_p = jnp.pad(wo.astype(jnp.float32), ((0, pad_h), (0, 0)))
    bo_p = bo.astype(jnp.float32)
    return (wa_p, ws_p, b_in, wo_p, bo_p)


def _choose_tile(batch, tile_b):
    """Tile rows: cap at tile_b; for smaller batches aim for >=2 grid steps
    (v7x megacore) while keeping the tile a multiple of 8 sublanes."""
    if batch >= tile_b:
        return tile_b
    return max(_SUBLANE, min(tile_b, _round_up(pl.cdiv(batch, 2), _SUBLANE)))


def critic_net_forward(s, a, packed_params, *, tile_b=4096):
    """Full CriticNet forward in one pallas_call (batch-tiled 1-D grid)."""
    wa_p, ws_p, b_in, wo_p, bo_p = packed_params
    B = s.shape[0]
    a_f = a.shape[1]
    s_f = s.shape[1]
    h_pad = wa_p.shape[1]
    n_out = wo_p.shape[1]

    a = a.astype(jnp.float32)
    s = s.astype(jnp.float32)

    tb = _choose_tile(B, tile_b)
    grid = (pl.cdiv(B, tb),)

    flops = 2 * B * (a_f + s_f) * h_pad + 2 * B * h_pad * n_out
    bytes_accessed = 4 * (a.size + s.size + wa_p.size + ws_p.size
                          + b_in.size + wo_p.size + bo_p.size + B * n_out)

    out = pl.pallas_call(
        critic_kernel,
        out_shape=jax.ShapeDtypeStruct((B, n_out), jnp.float32),
        grid=grid,
        in_specs=[
            pl.BlockSpec((tb, a_f), lambda i: (i, 0)),      # batch-tiled a
            pl.BlockSpec((tb, s_f), lambda i: (i, 0)),      # batch-tiled s
            pl.BlockSpec((a_f, h_pad), lambda i: (0, 0)),   # resident weights
            pl.BlockSpec((s_f, h_pad), lambda i: (0, 0)),
            pl.BlockSpec((1, h_pad), lambda i: (0, 0)),
            pl.BlockSpec((h_pad, n_out), lambda i: (0, 0)),
            pl.BlockSpec((1, n_out), lambda i: (0, 0)),
        ],
        out_specs=pl.BlockSpec((tb, n_out), lambda i: (i, 0)),
        compiler_params=pltpu.CompilerParams(
            dimension_semantics=("parallel",),
            vmem_limit_bytes=64 << 20),
        cost_estimate=pl.CostEstimate(
            flops=flops, transcendentals=0, bytes_accessed=bytes_accessed),
    )(a, s, wa_p, ws_p, b_in, wo_p, bo_p)
    return out


def init_params(key, a_features, s_features, n_hidden=30, n_outputs=1):
    """Deterministic init mimicking torch.nn.Linear default (U[-1/sqrt(fan_in), +])."""
    ks = jax.random.split(key, 6)

    def linear(kw, kb, fan_in, fan_out):
        bound = 1.0 / jnp.sqrt(fan_in)
        # stored as (in_features, out_features) == transposed PyTorch weight
        w = jax.random.uniform(kw, (fan_in, fan_out), jnp.float32, -bound, bound)
        b = jax.random.uniform(kb, (1, fan_out), jnp.float32, -bound, bound)
        return w, b

    wa, ba = linear(ks[0], ks[1], a_features, n_hidden)
    ws, bs = linear(ks[2], ks[3], s_features, n_hidden)
    wo, bo = linear(ks[4], ks[5], n_hidden, n_outputs)
    return (wa, ba, ws, bs, wo, bo)


def reference_forward(s, a, params):
    wa, ba, ws, bs, wo, bo = params
    x1 = a @ wa + ba
    x2 = s @ ws + bs
    x = jnp.maximum(x1 + x2, 0.0)
    return x @ wo + bo


if __name__ == "__main__":
    a_features = 4
    s_features = 8
    n_hidden = 30          # torch default; exercises the hidden-dim padding
    n_outputs = 1

    key = jax.random.PRNGKey(0)
    k_s, k_a, k_p = jax.random.split(key, 3)
    params = init_params(k_p, a_features, s_features, n_hidden, n_outputs)
    packed = pack_params(params)   # one-time packing, reused across calls

    # Small check (B=2), matching the module's typical usage.
    B = 2
    s = jax.random.normal(k_s, (B, s_features), dtype=jnp.float32)
    a = jax.random.normal(k_a, (B, a_features), dtype=jnp.float32)
    out = jax.block_until_ready(critic_net_forward(s, a, packed))
    ref = reference_forward(s, a, params)
    assert out.shape == (B, n_outputs), out.shape
    assert jnp.allclose(out, ref, atol=1e-5, rtol=1e-5), (out, ref)

    # Multi-tile grid check with a ragged batch (exercises the masked partial
    # edge block: 300 = 4*64 + 44).
    B2 = 300
    s2 = jax.random.normal(k_s, (B2, s_features), dtype=jnp.float32)
    a2 = jax.random.normal(k_a, (B2, a_features), dtype=jnp.float32)
    out2 = jax.block_until_ready(critic_net_forward(s2, a2, packed, tile_b=64))
    ref2 = reference_forward(s2, a2, params)
    assert out2.shape == (B2, n_outputs), out2.shape
    assert jnp.allclose(out2, ref2, atol=1e-5, rtol=1e-5)

    print("KERNEL_OK")
</pallas_src>

<mosaic_0001>
module attributes {stable_mosaic.version = 11 : i64} {
  func.func @critic_kernel(%arg0: i32, %arg1: memref<8x4xf32, #tpu.memory_space<vmem>>, %arg2: memref<8x8xf32, #tpu.memory_space<vmem>>, %arg3: memref<4x128xf32, #tpu.memory_space<vmem>>, %arg4: memref<8x128xf32, #tpu.memory_space<vmem>>, %arg5: memref<1x128xf32, #tpu.memory_space<vmem>>, %arg6: memref<128x1xf32, #tpu.memory_space<vmem>>, %arg7: memref<1x1xf32, #tpu.memory_space<vmem>>, %arg8: memref<8x1xf32, #tpu.memory_space<vmem>>) attributes {dimension_semantics = [#tpu.dimension_semantics<parallel>], iteration_bounds = array<i64: 1>, scalar_prefetch = 0 : i64, scratch_operands = 0 : i64, tpu.core_type = #tpu.core_type<tc>, window_params = [{transform_indices = @transform_0, window_bounds = array<i64: 8, 4>}, {transform_indices = @transform_1, window_bounds = array<i64: 8, 8>}, {pipeline_mode = #tpu.pipeline_mode<synchronous>, transform_indices = @transform_2, window_bounds = array<i64: 4, 128>}, {pipeline_mode = #tpu.pipeline_mode<synchronous>, transform_indices = @transform_3, window_bounds = array<i64: 8, 128>}, {pipeline_mode = #tpu.pipeline_mode<synchronous>, transform_indices = @transform_4, window_bounds = array<i64: 1, 128>}, {pipeline_mode = #tpu.pipeline_mode<synchronous>, transform_indices = @transform_5, window_bounds = array<i64: 128, 1>}, {pipeline_mode = #tpu.pipeline_mode<synchronous>, transform_indices = @transform_6, window_bounds = array<i64: 1, 1>}, {transform_indices = @transform_7, window_bounds = array<i64: 8, 1>}]} {
    %c0 = arith.constant 0 : index
    %c0_0 = arith.constant 0 : index
    %0 = vector.load %arg1[%c0, %c0_0] : memref<8x4xf32, #tpu.memory_space<vmem>>, vector<8x4xf32>
    %c0_1 = arith.constant 0 : index
    %c0_2 = arith.constant 0 : index
    %1 = vector.load %arg3[%c0_1, %c0_2] : memref<4x128xf32, #tpu.memory_space<vmem>>, vector<4x128xf32>
    %cst = arith.constant dense<0.000000e+00> : vector<8x128xf32>
    %2 = tpu.matmul %0, %1, %cst {dimension_numbers = #tpu.dot_dimension_numbers<[1], [0], [0], [1], [0, 0, 1, 1], [], []>} : vector<8x4xf32>, vector<4x128xf32>, vector<8x128xf32> -> vector<8x128xf32>
    %c0_3 = arith.constant 0 : index
    %c0_4 = arith.constant 0 : index
    %3 = vector.load %arg2[%c0_3, %c0_4] : memref<8x8xf32, #tpu.memory_space<vmem>>, vector<8x8xf32>
    %c0_5 = arith.constant 0 : index
    %c0_6 = arith.constant 0 : index
    %4 = vector.load %arg4[%c0_5, %c0_6] : memref<8x128xf32, #tpu.memory_space<vmem>>, vector<8x128xf32>
    %cst_7 = arith.constant dense<0.000000e+00> : vector<8x128xf32>
    %5 = tpu.matmul %3, %4, %cst_7 {dimension_numbers = #tpu.dot_dimension_numbers<[1], [0], [0], [1], [0, 0, 1, 1], [], []>} : vector<8x8xf32>, vector<8x128xf32>, vector<8x128xf32> -> vector<8x128xf32>
    %6 = arith.addf %2, %5 : vector<8x128xf32>
    %c0_8 = arith.constant 0 : index
    %c0_9 = arith.constant 0 : index
    %7 = vector.load %arg5[%c0_8, %c0_9] : memref<1x128xf32, #tpu.memory_space<vmem>>, vector<1x128xf32>
    %8 = vector.broadcast %7 : vector<1x128xf32> to vector<8x128xf32>
    %9 = arith.addf %6, %8 : vector<8x128xf32>
    %cst_10 = arith.constant 0.000000e+00 : f32
    %10 = vector.broadcast %cst_10 : f32 to vector<8x128xf32>
    %11 = arith.maximumf %9, %10 : vector<8x128xf32>
    %c0_11 = arith.constant 0 : index
    %c0_12 = arith.constant 0 : index
    %12 = vector.load %arg6[%c0_11, %c0_12] : memref<128x1xf32, #tpu.memory_space<vmem>>, vector<128x1xf32>
    %cst_13 = arith.constant dense<0.000000e+00> : vector<8x1xf32>
    %13 = tpu.matmul %11, %12, %cst_13 {dimension_numbers = #tpu.dot_dimension_numbers<[1], [0], [0], [1], [0, 0, 1, 1], [], []>} : vector<8x128xf32>, vector<128x1xf32>, vector<8x1xf32> -> vector<8x1xf32>
    %c0_14 = arith.constant 0 : index
    %c0_15 = arith.constant 0 : index
    %14 = vector.load %arg7[%c0_14, %c0_15] : memref<1x1xf32, #tpu.memory_space<vmem>>, vector<1x1xf32>
    %15 = vector.broadcast %14 : vector<1x1xf32> to vector<8x1xf32>
    %16 = arith.addf %13, %15 : vector<8x1xf32>
    %c0_16 = arith.constant 0 : index
    %c0_17 = arith.constant 0 : index
    %17 = vector.load %arg8[%c0_16, %c0_17] : memref<8x1xf32, #tpu.memory_space<vmem>>, vector<8x1xf32>
    tpu.vector_store %arg8[%c0_16, %c0_17], %16 {strides = array<i32>} : memref<8x1xf32, #tpu.memory_space<vmem>>, vector<8x1xf32>,
    return
  }
  func.func @transform_0(%arg0: i32) -> (i32, i32) {
    %c0_i32 = arith.constant 0 : i32
    %c0_i32_0 = arith.constant 0 : i32
    return %arg0, %c0_i32 : i32, i32
  }
  func.func @transform_1(%arg0: i32) -> (i32, i32) {
    %c0_i32 = arith.constant 0 : i32
    %c0_i32_0 = arith.constant 0 : i32
    return %arg0, %c0_i32 : i32, i32
  }
  func.func @transform_2(%arg0: i32) -> (i32, i32) {
    %c0_i32 = arith.constant 0 : i32
    %c0_i32_0 = arith.constant 0 : i32
    %c0_i32_1 = arith.constant 0 : i32
    return %c0_i32, %c0_i32_0 : i32, i32
  }
  func.func @transform_3(%arg0: i32) -> (i32, i32) {
    %c0_i32 = arith.constant 0 : i32
    %c0_i32_0 = arith.constant 0 : i32
    %c0_i32_1 = arith.constant 0 : i32
    return %c0_i32, %c0_i32_0 : i32, i32
  }
  func.func @transform_4(%arg0: i32) -> (i32, i32) {
    %c0_i32 = arith.constant 0 : i32
    %c0_i32_0 = arith.constant 0 : i32
    %c0_i32_1 = arith.constant 0 : i32
    return %c0_i32, %c0_i32_0 : i32, i32
  }
  func.func @transform_5(%arg0: i32) -> (i32, i32) {
    %c0_i32 = arith.constant 0 : i32
    %c0_i32_0 = arith.constant 0 : i32
    %c0_i32_1 = arith.constant 0 : i32
    return %c0_i32, %c0_i32_0 : i32, i32
  }
  func.func @transform_6(%arg0: i32) -> (i32, i32) {
    %c0_i32 = arith.constant 0 : i32
    %c0_i32_0 = arith.constant 0 : i32
    %c0_i32_1 = arith.constant 0 : i32
    return %c0_i32, %c0_i32_0 : i32, i32
  }
  func.func @transform_7(%arg0: i32) -> (i32, i32) {
    %c0_i32 = arith.constant 0 : i32
    %c0_i32_0 = arith.constant 0 : i32
    return %arg0, %c0_i32 : i32, i32
  }
}

</mosaic_0001>

<bundles_post_ra>
// kernel: tpu_custom_call.1
= control target key start
LH: loop header
LB: loop body
LE: loop exit
PB: predicated region body
PF: predicated region fallthrough
CT: control target
= control target key end

     0   :  { %s287_s0 = inlined_call_operand.vmem [shape: f32[2,4], index: 0, kind: input, shape index: {}]   ;;  %s288_s1 = inlined_call_operand.vmem [shape: f32[2,8], index: 1, kind: input, shape index: {}]   ;;  %s289_s2 = inlined_call_operand.vmem [shape: f32[4,128], index: 2, kind: input, shape index: {}]   ;;  %s290_s3 = inlined_call_operand.vmem [shape: f32[8,128], index: 3, kind: input, shape index: {}]   ;;  %s291_s4 = inlined_call_operand.vmem [shape: f32[1,128], index: 4, kind: input, shape index: {}]   ;;  %s292_s5 = inlined_call_operand.vmem [shape: f32[128,1], index: 5, kind: input, shape index: {}]   ;;  %s293_s6 = inlined_call_operand.<no memory space> [shape: f32[1,1], index: 6, kind: input, shape index: {}]   ;;  %s294_s7 = inlined_call_operand.vmem [shape: f32[2,1], index: 7, kind: output, shape index: {}]  }
   0x1   :  { %v12_v0 = vstv %s293_s6 }
   0x2   :  { %13 = vst [vmem:[#allocation2] sm:$0x1] %v12_v0 }
   0x3   :  { %v31_v1 = vld [vmem:[%s290_s3] sm:$0xff]  ;;  %vm60_vm0 = vcmask 1043456   ;;  %vm32_vm1 = vcmask 64512   ;;  %vm56_vm2 = vcmask 31744   ;;  %v105_v5 = vld [vmem:[%s292_s5 + $0x78] sm:$0xff]  ;;  %v104_v6 = vld [vmem:[%s292_s5 + $0x70] sm:$0xff] }
   0x4   :  { %v29_v2 = vld [vmem:[%s289_s2] sm:$0xf]  ;;  %51 = vmatpush.msra.mxu0 %v31_v1  ;;  %110 = vmatpush.msra.mxu2 %v105_v5  ;;  %v103_v7 = vld [vmem:[%s292_s5 + $0x68] sm:$0xff]  ;;  %v101_v9 = vld [vmem:[%s292_s5 + $0x58] sm:$0xff]  ;;  %vm130_vm3 = vcmask 7168  }
   0x5   :  { %v30_v3 = vld [vmem:[%s288_s1] sm:$0xff]  ;;  %174 = vmatpush.msk.msra.mxu1 %vm60_vm0, %v29_v2  ;;  %v100_v10 = vld [vmem:[%s292_s5 + $0x50] sm:$0xff]  ;;  %v99_v11 = vld [vmem:[%s292_s5 + $0x48] sm:$0xff] }
   0x6   :  { %v28_v4 = vld [vmem:[%s287_s0] sm:$0xff]  ;;  %173 = vmatmul.msk.f32.vlgmr.msra.gmra.mxu0 %vm32_vm1, %v30_v3  ;;  %111 = vmatpush.msra.mxu2 %v104_v6  ;;  %v97_v13 = vld [vmem:[%s292_s5 + $0x38] sm:$0xff]  ;;  %v96_v14 = vld [vmem:[%s292_s5 + $0x30] sm:$0xff] }
   0x7   :  { %175 = vmatmul.msk.f32.vlgmr.msra.gmra.mxu1 %vm56_vm2, %v28_v4  ;;  %v102_v8 = vld [vmem:[%s292_s5 + $0x60] sm:$0xff]  ;;  %v95_v15 = vld [vmem:[%s292_s5 + $0x28] sm:$0xff]  ;;  %v93_v17 = vld [vmem:[%s292_s5 + $0x18] sm:$0xff] }
   0x8   :  { %112 = vmatpush.msra.mxu2 %v103_v7  ;;  %v98_v12 = vld [vmem:[%s292_s5 + $0x40] sm:$0xff]  ;;  %v92_v18 = vld [vmem:[%s292_s5 + $0x10] sm:$0xff]  ;;  %v91_v19 = vld [vmem:[%s292_s5 + $0x8] sm:$0xff] }
   0x9   :  { %v94_v16 = vld [vmem:[%s292_s5 + $0x20] sm:$0xff] }
   0xa   :  { %113 = vmatpush.msra.mxu2 %v102_v8  ;;  %v90_v20 = vld [vmem:[%s292_s5] sm:$0xff] }
   0xb   :  { %v176_v21 = vld [vmem:[%s291_s4] ss:$0 sm:$0xff] }
   0xc   :  { %114 = vmatpush.msra.mxu2 %v101_v9  ;;  %v177_v27 = vld [vmem:[#allocation2] ss:$0 sm:$0xff] }
   0xe   :  { %115 = vmatpush.msra.mxu2 %v100_v10 }
  0x10   :  { %116 = vmatpush.msra.mxu2 %v99_v11 }
  0x12   :  { %117 = vmatpush.msra.mxu2 %v98_v12 }
  0x14   :  { %118 = vmatpush.msra.mxu2 %v97_v13 }
  0x16   :  { %119 = vmatpush.msra.mxu2 %v96_v14 }
  0x18   :  { %120 = vmatpush.msra.mxu2 %v95_v15 }
  0x1a   :  { %121 = vmatpush.msra.mxu2 %v94_v16 }
  0x1c   :  { %122 = vmatpush.msra.mxu2 %v93_v17 }
  0x1e   :  { %123 = vmatpush.msra.mxu2 %v92_v18 }
  0x20   :  { %124 = vmatpush.msra.mxu2 %v91_v19 }
  0x22   :  { %125 = vmatpush.msra.mxu2 %v90_v20 }
  0x83   :  { %v53_v22 = vpop.f32.mrf.mxu0 }
  0x84   :  { %v81_v23 = vpop.f32.mrf.mxu1 }
  0x85   :  { %v82_v24 = vadd.f32 %v81_v23, %v53_v22 }
  0x87   :  { %v88_v25 = vadd.f32 %v176_v21, %v82_v24 }
  0x89   :  { %v89_v26 = vmax.f32 %v88_v25, 0.0 }
  0x8b   :  { %126 = vmatmul.f32.vlgmr.msra.gmra.mxu2 %v89_v26 }
 0x10e   :  { %v127_v28 = vpop.f32.mrf.mxu2 }
 0x10f   :  { %v128_v29 = vadd.f32 %v177_v27, %v127_v28 }
 0x111   :  { %131 = vst.msk [vmem:[#allocation3] sm:$0xff] %vm130_vm3, %v128_v29 }
 0x118   :  { %v150_v30 = vld [vmem:[#allocation3] sm:$0x3] }
 0x119   :  { %151 = vst [vmem:[%s294_s7] sm:$0x3] %v150_v30 }

</bundles_post_ra>
